<compile_context>
chip_gen: v5e
topology: v5e:2x2
jax: 0.10.0
libtpu: 0.0.40
codegen_flags: <defaults>
</compile_context>

<pallas_src>
import numpy as np
import jax
import jax.numpy as jnp
from jax.experimental import pallas as pl
from jax.experimental.pallas import tpu as pltpu

LEAKY_SLOPE = 0.01   # MinkowskiLeakyReLU default negative_slope
BN_EPS = 1e-5        # MinkowskiBatchNorm (nn.BatchNorm1d) default eps
LANE = 128
ROW_PACK = 16        # bf16 packs 2 rows per sublane -> min row tile is 16


def _round_up(x, m):
    return (x + m - 1) // m * m


def conv_bn_relu_kernel(nvalid_ref, x_ref, w_ref, gamma_ref, beta_ref, out_ref):
    """Single-invocation fused sparse-conv + BN + LeakyReLU.

    nvalid_ref: (1,) int32 SMEM      -- number of valid (non-padded) points
    x_ref:      (N_pad, KC_pad) bf16 -- gathered-neighbor feature slab
    w_ref:      (KC_pad, C_pad) bf16 -- conv weights with K folded into rows
    gamma_ref:  (1, C_pad) f32       -- BN affine scale (zero in the pad lanes)
    beta_ref:   (1, C_pad) f32       -- BN affine shift (zero in the pad lanes)
    out_ref:    (N_pad, C_pad) f32   -- lane-dense output
    """
    # Sparse conv: sum over K offsets & C_in folded into one contraction dim.
    # bf16 operands, f32 accumulation on the MXU.
    y = jnp.dot(x_ref[...], w_ref[...], preferred_element_type=jnp.float32)

    # BatchNorm1d, training mode, biased batch statistics over the valid rows.
    # Padded slab rows are all-zero -> y is exactly 0 there, so no row mask is
    # needed for either sum.  Single fused pass: E[x] and E[x^2].
    count = jnp.maximum(nvalid_ref[0], 1).astype(jnp.float32)
    s1 = jnp.sum(y, axis=0, keepdims=True)
    s2 = jnp.sum(y * y, axis=0, keepdims=True)
    mean = s1 / count
    var = jnp.maximum(s2 / count - mean * mean, 0.0)

    # Fold BN (normalize + affine) into one scale/shift per output channel.
    scale = gamma_ref[...] * jax.lax.rsqrt(var + BN_EPS)
    shift = beta_ref[...] - mean * scale
    z = y * scale + shift

    # LeakyReLU (slope < 1 => max(z, slope*z)); pads sliced off in the wrapper.
    out_ref[...] = jnp.maximum(z, LEAKY_SLOPE * z)


def conv_bn_relu_pallas(feats, neighbor_idx, weights, gamma, beta):
    """feats: (N, C_in) f32, neighbor_idx: (K, N) int32 (N == zero-pad row),
    weights: (K, C_in, C_out) f32, gamma/beta: (1, C_out) f32."""
    N, C_in = feats.shape
    K, _, C_out = weights.shape

    n_pad = _round_up(max(N, ROW_PACK), ROW_PACK)
    kc = K * C_in
    kc_pad = _round_up(kc, LANE)
    c_pad = _round_up(C_out, LANE)

    # Build the (N, K*C_in) slab once (glue, plain JAX); missing neighbors = 0.
    # Indexing with neighbor_idx.T gives (N, K, C_in) directly -> the reshape
    # is a contiguous view, no transpose / extra HBM round trip.
    feats_z = jnp.concatenate([feats, jnp.zeros((1, C_in), feats.dtype)], axis=0)
    slab = feats_z[neighbor_idx.T].reshape(N, kc)
    slab = jnp.pad(slab, ((0, n_pad - N), (0, kc_pad - kc))).astype(jnp.bfloat16)

    # Fold K into the weight rows with the same (k, c_in) ordering as the slab.
    w = weights.reshape(kc, C_out)
    w = jnp.pad(w, ((0, kc_pad - kc), (0, c_pad - C_out))).astype(jnp.bfloat16)

    gamma_p = jnp.pad(gamma.reshape(1, C_out).astype(jnp.float32),
                      ((0, 0), (0, c_pad - C_out)))
    beta_p = jnp.pad(beta.reshape(1, C_out).astype(jnp.float32),
                     ((0, 0), (0, c_pad - C_out)))
    nvalid = jnp.array([N], dtype=jnp.int32)

    out = pl.pallas_call(
        conv_bn_relu_kernel,
        out_shape=jax.ShapeDtypeStruct((n_pad, c_pad), jnp.float32),
        in_specs=[
            pl.BlockSpec(memory_space=pltpu.MemorySpace.SMEM),   # nvalid
            pl.BlockSpec(memory_space=pltpu.MemorySpace.VMEM),   # slab
            pl.BlockSpec(memory_space=pltpu.MemorySpace.VMEM),   # weights
            pl.BlockSpec(memory_space=pltpu.MemorySpace.VMEM),   # gamma
            pl.BlockSpec(memory_space=pltpu.MemorySpace.VMEM),   # beta
        ],
        out_specs=pl.BlockSpec(memory_space=pltpu.MemorySpace.VMEM),
        compiler_params=pltpu.CompilerParams(
            # v5e's scoped-VMEM default is only 16 MiB; raise it explicitly so
            # larger single-shot N runs. 32 MiB is safe on v5e/v6e/v7x.
            vmem_limit_bytes=32 * 1024 * 1024,
        ),
    )(nvalid, slab, w, gamma_p, beta_p)

    return out[:N, :C_out]


def build_kernel_map(coords_np, kernel_size=3, dilation=1, dimension=3):
    """stride=1 sparse conv: output coords == input coords.

    Returns neighbor_idx (K, N): for offset k and output point i, the index j of
    the input point at coord[i] + offset[k]*dilation, or N (zero-pad row) if
    that coordinate is unoccupied.  (MinkowskiEngine coordinate-manager glue,
    done on host in NumPy.)
    """
    N = coords_np.shape[0]
    coord_to_idx = {tuple(c): i for i, c in enumerate(coords_np.tolist())}
    r = kernel_size // 2
    offsets = [(dx, dy, dz)
               for dx in range(-r, r + 1)
               for dy in range(-r, r + 1)
               for dz in range(-r, r + 1)]
    K = len(offsets)
    neighbor_idx = np.full((K, N), N, dtype=np.int32)
    for k, off in enumerate(offsets):
        for i in range(N):
            nb = (coords_np[i, 0] + off[0] * dilation,
                  coords_np[i, 1] + off[1] * dilation,
                  coords_np[i, 2] + off[2] * dilation)
            neighbor_idx[k, i] = coord_to_idx.get(nb, N)
    return neighbor_idx


def reference_forward(feats, neighbor_idx, weights, gamma, beta):
    """Pure-JAX f32 reference matching the PyTorch module semantics."""
    N, C_in = feats.shape
    feats_pad = jnp.concatenate([feats, jnp.zeros((1, C_in), feats.dtype)], axis=0)
    gathered = feats_pad[neighbor_idx]                   # (K, N, C_in)
    y = jnp.einsum("kni,kio->no", gathered, weights)     # sparse conv (bias=False)
    mean = jnp.mean(y, axis=0, keepdims=True)
    var = jnp.mean((y - mean) ** 2, axis=0, keepdims=True)
    z = gamma * (y - mean) / jnp.sqrt(var + BN_EPS) + beta
    return jnp.where(z > 0, z, LEAKY_SLOPE * z)


if __name__ == "__main__":
    # Module config: ConvBnReLU(inplanes=4, planes=8, kernel_size=3, stride=1,
    #                           dilation=1, dimension=3)
    inplanes, planes = 4, 8
    kernel_size, stride, dilation, dimension = 3, 1, 1, 3
    K = kernel_size ** dimension                   # 27 kernel offsets
    N = 64                                         # number of sparse points

    key = jax.random.PRNGKey(0)
    k_coords, k_feats, k_w, k_gamma, k_beta = jax.random.split(key, 5)

    # Unique integer coordinates inside an 8^3 grid.
    flat = jax.random.permutation(k_coords, 8 * 8 * 8)[:N]
    coords_np = np.stack(np.unravel_index(np.asarray(flat), (8, 8, 8)), axis=1).astype(np.int32)

    # Deterministic synthetic parameters (shapes match the module; conv bias=False).
    feats = jax.random.normal(k_feats, (N, inplanes), dtype=jnp.float32)
    weights = jax.random.normal(k_w, (K, inplanes, planes), dtype=jnp.float32) * 0.1
    gamma = 1.0 + 0.1 * jax.random.normal(k_gamma, (1, planes), dtype=jnp.float32)
    beta = 0.1 * jax.random.normal(k_beta, (1, planes), dtype=jnp.float32)

    neighbor_idx = jnp.asarray(build_kernel_map(coords_np, kernel_size, dilation, dimension))

    out = conv_bn_relu_pallas(feats, neighbor_idx, weights, gamma, beta)
    out = jax.block_until_ready(out)

    ref = reference_forward(feats, neighbor_idx, weights, gamma, beta)
    # Tolerance loosened for bf16 MXU operands (accumulation + epilogue are f32).
    np.testing.assert_allclose(np.asarray(out), np.asarray(ref), rtol=5e-2, atol=5e-2)

    print("KERNEL_OK")
</pallas_src>

<mosaic_0001>
module attributes {stable_mosaic.version = 11 : i64} {
  func.func @conv_bn_relu_kernel(%arg0: memref<1xi32, #tpu.memory_space<smem>>, %arg1: memref<64x128xbf16, #tpu.memory_space<vmem>>, %arg2: memref<128x128xbf16, #tpu.memory_space<vmem>>, %arg3: memref<1x128xf32, #tpu.memory_space<vmem>>, %arg4: memref<1x128xf32, #tpu.memory_space<vmem>>, %arg5: memref<64x128xf32, #tpu.memory_space<vmem>>) attributes {dimension_semantics = [], scalar_prefetch = 0 : i64, scratch_operands = 0 : i64, tpu.core_type = #tpu.core_type<tc>} {
    %c0 = arith.constant 0 : index
    %c0_0 = arith.constant 0 : index
    %0 = vector.load %arg1[%c0, %c0_0] : memref<64x128xbf16, #tpu.memory_space<vmem>>, vector<64x128xbf16>
    %c0_1 = arith.constant 0 : index
    %c0_2 = arith.constant 0 : index
    %1 = vector.load %arg2[%c0_1, %c0_2] : memref<128x128xbf16, #tpu.memory_space<vmem>>, vector<128x128xbf16>
    %cst = arith.constant dense<0.000000e+00> : vector<64x128xf32>
    %2 = tpu.matmul %0, %1, %cst {dimension_numbers = #tpu.dot_dimension_numbers<[1], [0], [0], [1], [0, 0, 1, 1], [], []>} : vector<64x128xbf16>, vector<128x128xbf16>, vector<64x128xf32> -> vector<64x128xf32>
    %c0_3 = arith.constant 0 : index
    %3 = memref.load %arg0[%c0_3] : memref<1xi32, #tpu.memory_space<smem>>
    %c1_i32 = arith.constant 1 : i32
    %4 = arith.maxsi %3, %c1_i32 : i32
    %5 = arith.sitofp %4 : i32 to f32
    %cst_4 = arith.constant dense<0.000000e+00> : vector<128xf32>
    %6 = vector.multi_reduction <add>, %2, %cst_4 [0] : vector<64x128xf32> to vector<128xf32>
    %7 = vector.shape_cast %6 : vector<128xf32> to vector<1x128xf32>
    %8 = arith.mulf %2, %2 : vector<64x128xf32>
    %cst_5 = arith.constant dense<0.000000e+00> : vector<128xf32>
    %9 = vector.multi_reduction <add>, %8, %cst_5 [0] : vector<64x128xf32> to vector<128xf32>
    %10 = vector.shape_cast %9 : vector<128xf32> to vector<1x128xf32>
    %11 = vector.broadcast %5 : f32 to vector<1x128xf32>
    %12 = arith.divf %7, %11 : vector<1x128xf32>
    %13 = vector.broadcast %5 : f32 to vector<1x128xf32>
    %14 = arith.divf %10, %13 : vector<1x128xf32>
    %15 = arith.mulf %12, %12 : vector<1x128xf32>
    %16 = arith.subf %14, %15 : vector<1x128xf32>
    %cst_6 = arith.constant 0.000000e+00 : f32
    %17 = vector.broadcast %cst_6 : f32 to vector<1x128xf32>
    %18 = arith.maximumf %16, %17 : vector<1x128xf32>
    %c0_7 = arith.constant 0 : index
    %c0_8 = arith.constant 0 : index
    %19 = vector.load %arg3[%c0_7, %c0_8] : memref<1x128xf32, #tpu.memory_space<vmem>>, vector<1x128xf32>
    %cst_9 = arith.constant 9.99999974E-6 : f32
    %20 = vector.broadcast %cst_9 : f32 to vector<1x128xf32>
    %21 = arith.addf %18, %20 : vector<1x128xf32>
    %22 = math.rsqrt %21 : vector<1x128xf32>
    %23 = arith.mulf %19, %22 : vector<1x128xf32>
    %c0_10 = arith.constant 0 : index
    %c0_11 = arith.constant 0 : index
    %24 = vector.load %arg4[%c0_10, %c0_11] : memref<1x128xf32, #tpu.memory_space<vmem>>, vector<1x128xf32>
    %25 = arith.mulf %12, %23 : vector<1x128xf32>
    %26 = arith.subf %24, %25 : vector<1x128xf32>
    %27 = vector.broadcast %23 : vector<1x128xf32> to vector<64x128xf32>
    %28 = arith.mulf %2, %27 : vector<64x128xf32>
    %29 = vector.broadcast %26 : vector<1x128xf32> to vector<64x128xf32>
    %30 = arith.addf %28, %29 : vector<64x128xf32>
    %cst_12 = arith.constant 0.00999999977 : f32
    %31 = vector.broadcast %cst_12 : f32 to vector<64x128xf32>
    %32 = arith.mulf %31, %30 : vector<64x128xf32>
    %33 = arith.maximumf %30, %32 : vector<64x128xf32>
    %c0_13 = arith.constant 0 : index
    %c0_14 = arith.constant 0 : index
    %34 = vector.load %arg5[%c0_13, %c0_14] : memref<64x128xf32, #tpu.memory_space<vmem>>, vector<64x128xf32>
    tpu.vector_store %arg5[%c0_13, %c0_14], %33 {strides = array<i32>} : memref<64x128xf32, #tpu.memory_space<vmem>>, vector<64x128xf32>,
    return
  }
}

</mosaic_0001>

<bundles_post_ra>
// kernel: tpu_custom_call.1
= control target key start
LH: loop header
LB: loop body
LE: loop exit
PB: predicated region body
PF: predicated region fallthrough
CT: control target
= control target key end

     0   :  { %11 = vsyncpa [#allocation4], 0  ;;  %s592_s0 = inlined_call_operand.<no memory space> [shape: s32[1], index: 0, kind: input, shape index: {}]   ;;  %s593_s1 = inlined_call_operand.hbm [shape: bf16[64,128], index: 1, kind: input, shape index: {}]   ;;  %s594_s2 = inlined_call_operand.hbm [shape: bf16[128,128], index: 2, kind: input, shape index: {}]   ;;  %s595_s3 = inlined_call_operand.vmem [shape: f32[1,128], index: 3, kind: input, shape index: {}]   ;;  %s596_s4 = inlined_call_operand.vmem [shape: f32[1,128], index: 4, kind: input, shape index: {}]   ;;  %s597_s5 = inlined_call_operand.hbm [shape: f32[64,128], index: 5, kind: output, shape index: {}]  }
   0x1   :  { %12 = vsyncpa [#allocation7], 0 }
   0x2   :  { %13 = vsyncpa [#allocation5], 0  ;;  %s20_s20 = sshll.u32 %s593_s1, 4  ;;  %s492_s21 = smov [#allocation3]   ;;  %s21_s20 = int_to_ptr.hbm [resolvable:$true] %s20_s20 }
   0x3   :  { %s22_s22 = sshll.u32 %s492_s21, 4  ;;  %s33_s25 = sshll.u32 %s594_s2, 4  ;;  %s23_s22 = int_to_ptr.vmem [resolvable:$true] %s22_s22  ;;  %s34_s25 = int_to_ptr.hbm [resolvable:$true] %s33_s25 }
   0x4   :  { %s493_s26 = smov 64   ;;  %s494_s27 = smov 4  }
   0x5   :  { %28 = dma.hbm_to_vmem [thread:$0]  %s21_s20, 512, %s23_s22, [#allocation4], %s493_s26, %s493_s26, %s494_s27  }
   0x6   :  { %s495_s28 = smov [#allocation6]  }
   0x7   :  { %s35_s29 = sshll.u32 %s495_s28, 4  ;;  %s36_s29 = int_to_ptr.vmem [resolvable:$true] %s35_s29 }
   0x8   :  { %41 = dma.hbm_to_vmem [thread:$0]  %s34_s25, 1024, %s36_s29, [#allocation7], %s493_s26, %s493_s26, %s494_s27  }
   0x9   :  { %486 = dma.done.wait [#allocation4], 512  }
   0xa   :  { %487 = vsyncadd [#allocation4], 4294966784 }
   0xb   :  { %488 = dma.done.wait [#allocation7], 1024  }
   0xc   :  { %489 = vsyncadd [#allocation7], 4294966272  ;;  %v378_v0 = vld [vmem:[#allocation6 + $0x38] sm:$0xff]  ;;  %v377_v1 = vld [vmem:[#allocation6 + $0x30] sm:$0xff]  ;;  %p180_p0 = scmp.gt.s32.totalorder %s592_s0, 1  ;;  %s305_s13 = sshll.u32 %s597_s5, 4  ;;  %s306_s13 = int_to_ptr.hbm [resolvable:$true] %s305_s13 }
   0xd   :  { %150 = vmatpush.bf16.msra.mxu0 %v378_v0  ;;  %379 = vmatpush.bf16.msra.mxu1 %v378_v0  ;;  %v376_v2 = vld [vmem:[#allocation6 + $0x28] sm:$0xff]  ;;  %v375_v3 = vld [vmem:[#allocation6 + $0x20] sm:$0xff]  ;;  %v374_v4 = vld [vmem:[#allocation6 + $0x18] sm:$0xff]  ;;  %s497_s14 = smov 128   ;;  %s498_s15 = smov 8  }
   0xe   :  { %380 = vmatpush.bf16.msra.mxu2 %v378_v0  ;;  %381 = vmatpush.bf16.msra.mxu3 %v378_v0  ;;  %v373_v5 = vld [vmem:[#allocation6 + $0x10] sm:$0xff]  ;;  %v372_v6 = vld [vmem:[#allocation6 + $0x8] sm:$0xff]  ;;  %v371_v7 = vld [vmem:[#allocation6] sm:$0xff]  ;;  %s599_s0 = smov (!%p180_p0, %s592_s0), 1 }
   0xf   :  { %v367_v8 = vld [vmem:[#allocation3] sm:$0xff]  ;;  %v368_v9 = vld [vmem:[#allocation3 + $0x8] sm:$0xff]  ;;  %v369_v10 = vld [vmem:[#allocation3 + $0x10] sm:$0xff]  ;;  %s182_s7 = scvt.s32.f32 %s599_s0 }
  0x10   :  { %v370_v11 = vld [vmem:[#allocation3 + $0x18] sm:$0xff] }
  0x11   :  { %151 = vmatpush.bf16.msra.mxu0 %v377_v1  ;;  %382 = vmatpush.bf16.msra.mxu1 %v377_v1  ;;  %v217_v14 = vstv %s182_s7 }
  0x12   :  { %383 = vmatpush.bf16.msra.mxu2 %v377_v1  ;;  %384 = vmatpush.bf16.msra.mxu3 %v377_v1  ;;  %410 = vrcp.f32 %v217_v14  ;;  %vm223_vm0 = vweird.f32 %v217_v14  ;;  %v229_v48 = vand.u32 2147483648, %v217_v14  ;;  %v227_v52 = vand.u32 2147483647, %v217_v14 }
  0x14   :  { %v230_v55 = vor.u32 1.1754944e-38, %v229_v48  ;;  %vm228_vm3 = vcmp.eq.f32.partialorder %v227_v52, 8.507059e+37 }
  0x15   :  { %152 = vmatpush.bf16.msra.mxu0 %v376_v2  ;;  %385 = vmatpush.bf16.msra.mxu1 %v376_v2 }
  0x16   :  { %386 = vmatpush.bf16.msra.mxu2 %v376_v2  ;;  %387 = vmatpush.bf16.msra.mxu3 %v376_v2 }
  0x18   :  { %v411_v21 = vpop.eup %410 }
  0x19   :  { %153 = vmatpush.bf16.msra.mxu0 %v375_v3  ;;  %388 = vmatpush.bf16.msra.mxu1 %v375_v3  ;;  %v219_v29 = vmul.f32 %v411_v21, %v217_v14  ;;  %vm224_vm1 = vweird.f32 %v411_v21  ;;  %v237_v14 = vld [vmem:[%s595_s3] sm:$0x1]  ;;  %s496_s3 = smov [#allocation8]  }
  0x1a   :  { %389 = vmatpush.bf16.msra.mxu2 %v375_v3  ;;  %390 = vmatpush.bf16.msra.mxu3 %v375_v3  ;;  %vm225_vm2 = vmor %vm223_vm0, %vm224_vm1 }
  0x1b   :  { %v220_v37 = vsub.f32 1.0, %v219_v29 }
  0x1d   :  { %154 = vmatpush.bf16.msra.mxu0 %v374_v4  ;;  %391 = vmatpush.bf16.msra.mxu1 %v374_v4  ;;  %v221_v45 = vmul.f32 %v411_v21, %v220_v37 }
  0x1e   :  { %392 = vmatpush.bf16.msra.mxu2 %v374_v4  ;;  %393 = vmatpush.bf16.msra.mxu3 %v374_v4 }
  0x1f   :  { %v222_v51 = vadd.f32 %v411_v21, %v221_v45 }
  0x21   :  { %155 = vmatpush.bf16.msra.mxu0 %v373_v5  ;;  %394 = vmatpush.bf16.msra.mxu1 %v373_v5  ;;  %v226_v58 = vsel %vm225_vm2, %v411_v21, %v222_v51  ;;  %v250_v21 = vld [vmem:[%s596_s4] sm:$0x1]  ;;  %s303_s4 = sshll.u32 %s496_s3, 4  ;;  %s304_s4 = int_to_ptr.vmem [resolvable:$true] %s303_s4 }
  0x22   :  { %395 = vmatpush.bf16.msra.mxu2 %v373_v5  ;;  %396 = vmatpush.bf16.msra.mxu3 %v373_v5  ;;  %v231_v61 = vsel %vm228_vm3, %v230_v55, %v226_v58 }
  0x25   :  { %156 = vmatpush.bf16.msra.mxu0 %v372_v6  ;;  %397 = vmatpush.bf16.msra.mxu1 %v372_v6 }
  0x26   :  { %398 = vmatpush.bf16.msra.mxu2 %v372_v6  ;;  %399 = vmatpush.bf16.msra.mxu3 %v372_v6 }
  0x29   :  { %157 = vmatpush.bf16.msra.mxu0 %v371_v7  ;;  %400 = vmatpush.bf16.msra.mxu1 %v371_v7 }
  0x2a   :  { %401 = vmatpush.bf16.msra.mxu2 %v371_v7  ;;  %402 = vmatpush.bf16.msra.mxu3 %v371_v7 }
  0x2c   :  { %158 = vmatmul.bf16.vlgmr.msra.gmra.mxu0 %v367_v8  ;;  %163 = vmatmul.bf16.vlgmr.msra.gmra.mxu1 %v368_v9 }
  0x2d   :  { %168 = vmatmul.bf16.vlgmr.msra.gmra.mxu2 %v369_v10  ;;  %173 = vmatmul.bf16.vlgmr.msra.gmra.mxu3 %v370_v11 }
  0xa9   :  { %v541_v12 = vpop.f32.mrf.mxu0  ;;  %v543_v13 = vpop.f32.mrf.mxu1 }
  0xaa   :  { %v196_v18 = vmul.f32 %v541_v12, %v541_v12  ;;  %v198_v23 = vmul.f32 %v543_v13, %v543_v13 }
  0xb0   :  { %v545_v15 = vpop.f32.mrf.mxu2  ;;  %v547_v16 = vpop.f32.mrf.mxu3 }
  0xb1   :  { %v549_v17 = vpop.f32.mrf.mxu0  ;;  %v557_v22 = vpop.f32.mrf.mxu1  ;;  %v200_v30 = vmul.f32 %v545_v15, %v545_v15  ;;  %v202_v39 = vmul.f32 %v547_v16, %v547_v16 }
  0xb2   :  { %v183_v19 = vadd.f32 %v549_v17, %v541_v12  ;;  %v197_v20 = vmul.f32 %v549_v17, %v549_v17  ;;  %v199_v27 = vmul.f32 %v557_v22, %v557_v22 }
  0xb4   :  { %v204_v24 = vadd.f32 %v197_v20, %v196_v18  ;;  %v184_v25 = vadd.f32 %v183_v19, %v543_v13 }
  0xb6   :  { %v185_v26 = vadd.f32 %v184_v25, %v557_v22  ;;  %v205_v28 = vadd.f32 %v204_v24, %v198_v23 }
  0xb8   :  { %v206_v31 = vadd.f32 %v205_v28, %v199_v27  ;;  %v567_v32 = vpop.f32.mrf.mxu2  ;;  %v186_v33 = vadd.f32 %v185_v26, %v545_v15  ;;  %v176_v38 = vpop.f32.mrf.mxu3 }
  0xb9   :  { %v201_v35 = vmul.f32 %v567_v32, %v567_v32  ;;  %v203_v43 = vmul.f32 %v176_v38, %v176_v38 }
  0xba   :  { %v187_v34 = vadd.f32 %v186_v33, %v567_v32  ;;  %v207_v36 = vadd.f32 %v206_v31, %v200_v30 }
  0xbc   :  { %v208_v40 = vadd.f32 %v207_v36, %v201_v35  ;;  %v188_v41 = vadd.f32 %v187_v34, %v547_v16 }
  0xbe   :  { %v189_v42 = vadd.f32 %v188_v41, %v176_v38  ;;  %v209_v44 = vadd.f32 %v208_v40, %v202_v39 }
  0xc0   :  { %v190_v46 = vrot.slane %v189_v42, 4  ;;  %v210_v47 = vadd.f32 %v209_v44, %v203_v43 }
  0xc2   :  { %v191_v49 = vadd.f32 %v190_v46, %v189_v42  ;;  %v211_v50 = vrot.slane %v210_v47, 4 }
  0xc4   :  { %v192_v53 = vrot.slane %v191_v49, 2  ;;  %v212_v54 = vadd.f32 %v211_v50, %v210_v47 }
  0xc6   :  { %v193_v56 = vadd.f32 %v192_v53, %v191_v49  ;;  %v213_v57 = vrot.slane %v212_v54, 2 }
  0xc8   :  { %v194_v59 = vrot.slane %v193_v56, 1  ;;  %v214_v60 = vadd.f32 %v213_v57, %v212_v54 }
  0xca   :  { %v195_v62 = vadd.f32 %v194_v59, %v193_v56  ;;  %v215_v63 = vrot.slane %v214_v60, 1 }
  0xcc   :  { %v216_v0 = vadd.f32 %v215_v63, %v214_v60  ;;  %v232_v1 = vmul.f32 %v231_v61, %v195_v62 }
  0xce   :  { %v233_v2 = vmul.f32 %v231_v61, %v216_v0  ;;  %v234_v3 = vmul.f32 %v232_v1, %v232_v1 }
  0xd0   :  { %v235_v4 = vsub.f32 %v233_v2, %v234_v3 }
  0xd2   :  { %v236_v5 = vmax.f32 %v235_v4, 0.0 }
  0xd4   :  { %v238_v6 = vadd.f32 1e-05, %v236_v5 }
  0xd6   :  { %412 = vrsqrt.f32 %v238_v6  ;;  %vm245_vm5 = vweird.f32 %v238_v6 }
  0xdc   :  { %v413_v7 = vpop.eup %412 }
  0xdd   :  { %v240_v8 = vmul.f32 %v413_v7, %v238_v6  ;;  %vm246_vm4 = vweird.f32 %v413_v7 }
  0xde   :  { %vm247_vm6 = vmor %vm245_vm5, %vm246_vm4 }
  0xdf   :  { %v241_v9 = vmul.f32 %v413_v7, %v240_v8 }
  0xe1   :  { %v242_v10 = vmul.f32 0.5, %v241_v9 }
  0xe3   :  { %v243_v11 = vsub.f32 1.5, %v242_v10 }
  0xe5   :  { %v244_v18 = vmul.f32 %v413_v7, %v243_v11 }
  0xe7   :  { %v248_v19 = vsel %vm247_vm6, %v413_v7, %v244_v18 }
  0xe8   :  { %v249_v20 = vmul.f32 %v248_v19, %v237_v14 }
  0xea   :  { %v251_v23 = vmul.f32 %v249_v20, %v232_v1  ;;  %v254_v24 = vperm.slane %v249_v20, 0 }
  0xec   :  { %v252_v25 = vsub.f32 %v250_v21, %v251_v23  ;;  %v263_v26 = vmul.f32 %v254_v24, %v176_v38  ;;  %v256_v28 = vmul.f32 %v254_v24, %v541_v12  ;;  %v257_v29 = vmul.f32 %v254_v24, %v549_v17 }
  0xed   :  { %v258_v30 = vmul.f32 %v254_v24, %v543_v13  ;;  %v259_v31 = vmul.f32 %v254_v24, %v557_v22  ;;  %v260_v33 = vmul.f32 %v254_v24, %v545_v15  ;;  %v261_v34 = vmul.f32 %v254_v24, %v567_v32 }
  0xee   :  { %v265_v27 = vperm.slane %v252_v25, 0  ;;  %v262_v35 = vmul.f32 %v254_v24, %v547_v16 }
  0xf0   :  { %v274_v36 = vadd.f32 %v265_v27, %v263_v26  ;;  %v267_v37 = vadd.f32 %v265_v27, %v256_v28  ;;  %v268_v39 = vadd.f32 %v265_v27, %v257_v29  ;;  %v269_v40 = vadd.f32 %v265_v27, %v258_v30 }
  0xf1   :  { %v270_v38 = vadd.f32 %v265_v27, %v259_v31  ;;  %v271_v41 = vadd.f32 %v265_v27, %v260_v33  ;;  %v272_v42 = vadd.f32 %v265_v27, %v261_v34  ;;  %v273_v12 = vadd.f32 %v265_v27, %v262_v35 }
  0xf2   :  { %v282_v43 = vmul.f32 0.01, %v274_v36  ;;  %v275_v17 = vmul.f32 0.01, %v267_v37  ;;  %v276_v44 = vmul.f32 0.01, %v268_v39 }
  0xf3   :  { %v277_v13 = vmul.f32 0.01, %v269_v40  ;;  %v278_v45 = vmul.f32 0.01, %v270_v38  ;;  %v279_v22 = vmul.f32 0.01, %v271_v41 }
  0xf4   :  { %v290_v46 = vmax.f32 %v274_v36, %v282_v43  ;;  %v280_v15 = vmul.f32 0.01, %v272_v42  ;;  %v283_v47 = vmax.f32 %v267_v37, %v275_v17  ;;  %v281_v32 = vmul.f32 0.01, %v273_v12 }
  0xf5   :  { %v284_v48 = vmax.f32 %v268_v39, %v276_v44  ;;  %v285_v16 = vmax.f32 %v269_v40, %v277_v13  ;;  %v286_v49 = vmax.f32 %v270_v38, %v278_v45  ;;  %v287_v50 = vmax.f32 %v271_v41, %v279_v22 }
  0xf6   :  { %298 = vst [vmem:[#allocation8 + $0x38] sm:$0xff] %v290_v46  ;;  %v288_v51 = vmax.f32 %v272_v42, %v280_v15  ;;  %v289_v52 = vmax.f32 %v273_v12, %v281_v32 }
  0xf7   :  { %291 = vst [vmem:[#allocation8] sm:$0xff] %v283_v47 }
  0xf8   :  { %292 = vst [vmem:[#allocation8 + $0x8] sm:$0xff] %v284_v48 }
  0xf9   :  { %293 = vst [vmem:[#allocation8 + $0x10] sm:$0xff] %v285_v16 }
  0xfa   :  { %294 = vst [vmem:[#allocation8 + $0x18] sm:$0xff] %v286_v49 }
  0xfb   :  { %295 = vst [vmem:[#allocation8 + $0x20] sm:$0xff] %v287_v50 }
  0xfc   :  { %296 = vst [vmem:[#allocation8 + $0x28] sm:$0xff] %v288_v51 }
  0xfd   :  { %297 = vst [vmem:[#allocation8 + $0x30] sm:$0xff] %v289_v52 }
  0xfe   :  { %311 = dma.vmem_to_hbm [thread:$0]  %s304_s4, 1024, %s306_s13, [#allocation5], %s497_s14, %s497_s14, %s498_s15  }
  0xff   :  { %490 = dma.done.wait [#allocation5], 1024  }
 0x100   :  { %491 = vsyncadd [#allocation5], 4294966272 }
 0x101   :  { %316 = vsyncpa [#allocation4], 1 }
 0x102   :  { %317 = vsyncpa [#allocation7], 1 }
 0x103   :  { %318 = vsyncpa [#allocation5], 1 }

</bundles_post_ra>
